<compile_context>
chip_gen: v7x
topology: tpu7x:2x2x1
jax: 0.10.0
libtpu: 0.0.40
codegen_flags: <defaults>
</compile_context>

<pallas_src>
import numpy as np
import jax
import jax.numpy as jnp
from jax import lax
from jax.experimental import pallas as pl
from jax.experimental.pallas import tpu as pltpu

EPS = 1e-5
LANE = 128
VMEM_LIMIT = 32 * 1024 * 1024          # valid on v5e/v6e (128 MiB) and v7x (64 MiB)
BLOCK_BUDGET = 12 * 1024 * 1024        # ~single-count bytes per grid step


# --------------------------------------------------------------------------- utils
def _round_up(x, m):
    return ((x + m - 1) // m) * m


def _pad_axis(a, target, axis):
    if a.shape[axis] == target:
        return a
    widths = [(0, 0)] * a.ndim
    widths[axis] = (0, target - a.shape[axis])
    return jnp.pad(a, widths)


def _per_image_bytes(H, W, Ho, Wo, Cpi, Cpo, mb):
    pass2 = (H * W * Cpi * 4                    # x block (f32)
             + (H + 2) * (W + 2) * Cpi * mb     # padded activation scratch
             + Ho * Wo * 9 * Cpi * mb           # im2col scratch
             + Ho * Wo * Cpo * 4 * 2)           # h1 + res outputs (f32)
    pass3 = (Ho * Wo * Cpo * 4 * 3              # h1, res in + out (f32)
             + (Ho + 2) * (Wo + 2) * Cpo * mb
             + Ho * Wo * 9 * Cpo * mb)
    return max(pass2, pass3)


def _fixed_bytes(Cpi, Cpo, mb):
    return (9 * Cpi * Cpo + 9 * Cpo * Cpo + Cpi * Cpo) * mb   # conv/downsample weights


def _pick_batch_block(N, per_image, fixed, budget=BLOCK_BUDGET):
    """Largest divisor of N under the VMEM budget; keep >=2 grid steps when N>=2
    so the 'parallel' axis can shard across v7x's two TensorCores."""
    best = 1
    for d in range(1, N + 1):
        if N % d:
            continue
        if N >= 2 and d > N // 2:
            continue
        if fixed + d * per_image <= budget:
            best = d
    return best


# ------------------------------------------------------------------------- kernels
def _stats_kernel_factory(nb, H, W, Cp):
    """Per-channel sum / sum-of-squares partials for one batch block."""
    M = nb * H * W

    def kernel(x_ref, st_ref):
        xf = x_ref[...].reshape(M, Cp)
        s = jnp.sum(xf, axis=0, keepdims=True)
        ss = jnp.sum(xf * xf, axis=0, keepdims=True)
        st_ref[...] = jnp.concatenate([s, ss], axis=0).reshape(1, 2, Cp)

    return kernel


def _pass2_kernel_factory(nb, H, W, Ho, Wo, stride, Cpi, Cpo, downsample, mdt):
    """relu(bn1(x)) -> conv1 (3x3, stride) [+ 1x1 downsample residual] + BN2 partials."""
    M2 = nb * Ho * Wo
    span_h = (Ho - 1) * stride + 1
    span_w = (Wo - 1) * stride + 1

    def kernel(*refs):
        if downsample:
            (x_ref, sc1_ref, sh1_ref, w1_ref, cb1_ref, wd_ref, bd_ref,
             h1_ref, st2_ref, res_ref, pad1, col1) = refs
        else:
            (x_ref, sc1_ref, sh1_ref, w1_ref, cb1_ref,
             h1_ref, st2_ref, pad1, col1) = refs

        # BN1 (precomputed per-channel scale/shift) + ReLU in f32, cast for the MXU.
        sc1 = sc1_ref[...].reshape(1, 1, 1, Cpi)
        sh1 = sh1_ref[...].reshape(1, 1, 1, Cpi)
        a1 = jnp.maximum(x_ref[...] * sc1 + sh1, 0.0)
        a1m = a1.astype(mdt)

        # Residual path first (shortens a1's live range across the conv).
        if downsample:
            a1s = a1m[:, ::stride, ::stride, :].reshape(M2, Cpi)
            res = jnp.dot(a1s, wd_ref[...], preferred_element_type=jnp.float32)
            res_ref[...] = (res + bd_ref[...]).reshape(nb, Ho, Wo, Cpo)

        # Halo-only zeroing of the padded scratch + single interior write.
        pad1[:, 0:1, :, :] = jnp.zeros((nb, 1, W + 2, Cpi), mdt)
        pad1[:, H + 1:H + 2, :, :] = jnp.zeros((nb, 1, W + 2, Cpi), mdt)
        pad1[:, 1:H + 1, 0:1, :] = jnp.zeros((nb, H, 1, Cpi), mdt)
        pad1[:, 1:H + 1, W + 1:W + 2, :] = jnp.zeros((nb, H, 1, Cpi), mdt)
        pad1[:, 1:H + 1, 1:W + 1, :] = a1m

        # im2col -> one fat MXU matmul with K = 9*Cpi (instead of 9 skinny matmuls).
        xp = pad1[...]
        for kh in range(3):
            for kw in range(3):
                t = kh * 3 + kw
                patch = xp[:, kh:kh + span_h:stride, kw:kw + span_w:stride, :]
                col1[:, t * Cpi:(t + 1) * Cpi] = patch.reshape(M2, Cpi)

        h1 = jnp.dot(col1[...], w1_ref[...],
                     preferred_element_type=jnp.float32) + cb1_ref[...]
        h1_ref[...] = h1.reshape(nb, Ho, Wo, Cpo)

        # Per-block partial sums for BN2 batch statistics (reduced outside).
        s = jnp.sum(h1, axis=0, keepdims=True)
        ss = jnp.sum(h1 * h1, axis=0, keepdims=True)
        st2_ref[...] = jnp.concatenate([s, ss], axis=0).reshape(1, 2, Cpo)

    return kernel


def _pass3_kernel_factory(nb, Ho, Wo, Cpo, mdt):
    """relu(bn2(h1)) -> conv2 (3x3, stride 1) + bias + residual."""
    M2 = nb * Ho * Wo

    def kernel(h1_ref, sc2_ref, sh2_ref, w2_ref, cb2_ref, res_ref, out_ref,
               pad2, col2):
        sc2 = sc2_ref[...].reshape(1, 1, 1, Cpo)
        sh2 = sh2_ref[...].reshape(1, 1, 1, Cpo)
        a2 = jnp.maximum(h1_ref[...] * sc2 + sh2, 0.0).astype(mdt)

        pad2[:, 0:1, :, :] = jnp.zeros((nb, 1, Wo + 2, Cpo), mdt)
        pad2[:, Ho + 1:Ho + 2, :, :] = jnp.zeros((nb, 1, Wo + 2, Cpo), mdt)
        pad2[:, 1:Ho + 1, 0:1, :] = jnp.zeros((nb, Ho, 1, Cpo), mdt)
        pad2[:, 1:Ho + 1, Wo + 1:Wo + 2, :] = jnp.zeros((nb, Ho, 1, Cpo), mdt)
        pad2[:, 1:Ho + 1, 1:Wo + 1, :] = a2

        xp = pad2[...]
        for kh in range(3):
            for kw in range(3):
                t = kh * 3 + kw
                col2[:, t * Cpo:(t + 1) * Cpo] = \
                    xp[:, kh:kh + Ho, kw:kw + Wo, :].reshape(M2, Cpo)

        h2 = jnp.dot(col2[...], w2_ref[...], preferred_element_type=jnp.float32)
        out = h2 + (cb2_ref[...] + res_ref[...].reshape(M2, Cpo))
        out_ref[...] = out.reshape(nb, Ho, Wo, Cpo)

    return kernel


# ------------------------------------------------------------------------- wrapper
def wide_block_forward(x_nchw, params, *, stride=1, downsample=False,
                       matmul_dtype=jnp.bfloat16):
    N, Cin, H, W = x_nchw.shape
    Cout = params["w1"].shape[-1]
    if not downsample:
        assert Cin == Cout and stride == 1, "identity residual needs matching shapes"
    Ho = (H - 1) // stride + 1
    Wo = (W - 1) // stride + 1
    Cpi = _round_up(Cin, LANE)
    Cpo = _round_up(Cout, LANE)
    mdt = matmul_dtype
    mb = jnp.dtype(mdt).itemsize

    # NCHW -> NHWC, channels zero-padded to lane-dense multiples of 128.
    x = jnp.transpose(x_nchw, (0, 2, 3, 1)).astype(jnp.float32)
    x = _pad_axis(x, Cpi, 3)

    g1 = _pad_axis(params["g1"].astype(jnp.float32), Cpi, 1)
    b1 = _pad_axis(params["b1"].astype(jnp.float32), Cpi, 1)
    w1 = _pad_axis(_pad_axis(params["w1"].astype(jnp.float32), Cpi, 2), Cpo, 3)
    w1 = w1.reshape(9 * Cpi, Cpo).astype(mdt)                   # im2col weight layout
    cb1 = _pad_axis(params["cb1"].astype(jnp.float32), Cpo, 1)
    g2 = _pad_axis(params["g2"].astype(jnp.float32), Cpo, 1)
    b2 = _pad_axis(params["b2"].astype(jnp.float32), Cpo, 1)
    w2 = _pad_axis(_pad_axis(params["w2"].astype(jnp.float32), Cpo, 2), Cpo, 3)
    w2 = w2.reshape(9 * Cpo, Cpo).astype(mdt)
    cb2 = _pad_axis(params["cb2"].astype(jnp.float32), Cpo, 1)
    if downsample:
        wd = _pad_axis(_pad_axis(params["wd"].astype(jnp.float32), Cpi, 0), Cpo, 1)
        wd = wd.astype(mdt)
        bd = _pad_axis(params["bd"].astype(jnp.float32), Cpo, 1)

    nb = _pick_batch_block(N, _per_image_bytes(H, W, Ho, Wo, Cpi, Cpo, mb),
                           _fixed_bytes(Cpi, Cpo, mb))
    nblk = N // nb
    cparams = pltpu.CompilerParams(dimension_semantics=("parallel",),
                                   vmem_limit_bytes=VMEM_LIMIT)

    # ---- pass 1: BN1 batch statistics of x (per-block partial sums) --------------
    st1 = pl.pallas_call(
        _stats_kernel_factory(nb, H, W, Cpi),
        grid=(nblk,),
        in_specs=[pl.BlockSpec((nb, H, W, Cpi), lambda i: (i, 0, 0, 0))],
        out_specs=pl.BlockSpec((1, 2, Cpi), lambda i: (i, 0, 0)),
        out_shape=jax.ShapeDtypeStruct((nblk, 2, Cpi), jnp.float32),
        compiler_params=cparams,
    )(x)
    cnt1 = float(N * H * W)
    s1 = jnp.sum(st1, axis=0)
    mean1 = s1[0:1] / cnt1
    var1 = jnp.maximum(s1[1:2] / cnt1 - mean1 * mean1, 0.0)     # biased batch var
    scale1 = g1 * lax.rsqrt(var1 + EPS)
    shift1 = b1 - mean1 * scale1

    # ---- pass 2: relu(bn1) -> conv1 (+ residual) + BN2 partial stats --------------
    in_arrays = [x, scale1, shift1, w1, cb1]
    in_specs = [
        pl.BlockSpec((nb, H, W, Cpi), lambda i: (i, 0, 0, 0)),
        pl.BlockSpec((1, Cpi), lambda i: (0, 0)),
        pl.BlockSpec((1, Cpi), lambda i: (0, 0)),
        pl.BlockSpec((9 * Cpi, Cpo), lambda i: (0, 0)),
        pl.BlockSpec((1, Cpo), lambda i: (0, 0)),
    ]
    out_shapes = [jax.ShapeDtypeStruct((N, Ho, Wo, Cpo), jnp.float32),
                  jax.ShapeDtypeStruct((nblk, 2, Cpo), jnp.float32)]
    out_specs = [pl.BlockSpec((nb, Ho, Wo, Cpo), lambda i: (i, 0, 0, 0)),
                 pl.BlockSpec((1, 2, Cpo), lambda i: (i, 0, 0))]
    if downsample:
        in_arrays += [wd, bd]
        in_specs += [pl.BlockSpec((Cpi, Cpo), lambda i: (0, 0)),
                     pl.BlockSpec((1, Cpo), lambda i: (0, 0))]
        out_shapes.append(jax.ShapeDtypeStruct((N, Ho, Wo, Cpo), jnp.float32))
        out_specs.append(pl.BlockSpec((nb, Ho, Wo, Cpo), lambda i: (i, 0, 0, 0)))

    pass2_out = pl.pallas_call(
        _pass2_kernel_factory(nb, H, W, Ho, Wo, stride, Cpi, Cpo, downsample, mdt),
        grid=(nblk,),
        in_specs=in_specs,
        out_specs=tuple(out_specs),
        out_shape=tuple(out_shapes),
        scratch_shapes=[pltpu.VMEM((nb, H + 2, W + 2, Cpi), mdt),
                        pltpu.VMEM((nb * Ho * Wo, 9 * Cpi), mdt)],
        compiler_params=cparams,
    )(*in_arrays)
    if downsample:
        h1, st2, res = pass2_out
    else:
        h1, st2 = pass2_out
        res = x                                  # identity residual (padded channels = 0)

    cnt2 = float(N * Ho * Wo)
    s2 = jnp.sum(st2, axis=0)
    mean2 = s2[0:1] / cnt2
    var2 = jnp.maximum(s2[1:2] / cnt2 - mean2 * mean2, 0.0)
    scale2 = g2 * lax.rsqrt(var2 + EPS)
    shift2 = b2 - mean2 * scale2

    # ---- pass 3: relu(bn2) -> conv2 + bias + residual -----------------------------
    out = pl.pallas_call(
        _pass3_kernel_factory(nb, Ho, Wo, Cpo, mdt),
        grid=(nblk,),
        in_specs=[
            pl.BlockSpec((nb, Ho, Wo, Cpo), lambda i: (i, 0, 0, 0)),
            pl.BlockSpec((1, Cpo), lambda i: (0, 0)),
            pl.BlockSpec((1, Cpo), lambda i: (0, 0)),
            pl.BlockSpec((9 * Cpo, Cpo), lambda i: (0, 0)),
            pl.BlockSpec((1, Cpo), lambda i: (0, 0)),
            pl.BlockSpec((nb, Ho, Wo, Cpo), lambda i: (i, 0, 0, 0)),
        ],
        out_specs=pl.BlockSpec((nb, Ho, Wo, Cpo), lambda i: (i, 0, 0, 0)),
        out_shape=jax.ShapeDtypeStruct((N, Ho, Wo, Cpo), jnp.float32),
        scratch_shapes=[pltpu.VMEM((nb, Ho + 2, Wo + 2, Cpo), mdt),
                        pltpu.VMEM((nb * Ho * Wo, 9 * Cpo), mdt)],
        compiler_params=cparams,
    )(h1, scale2, shift2, w2, cb2, res)

    out = out[..., :Cout]                                   # drop channel padding
    return jnp.transpose(out, (0, 3, 1, 2))                 # NHWC -> NCHW


# ----------------------------------------------------------------- params & reference
def init_params(key, cin, cout, downsample):
    ks = jax.random.split(key, 10)
    p = {
        "g1": jax.random.uniform(ks[0], (1, cin), jnp.float32, 0.5, 1.5),
        "b1": 0.1 * jax.random.normal(ks[1], (1, cin), jnp.float32),
        "w1": 0.2 * jax.random.normal(ks[2], (3, 3, cin, cout), jnp.float32),  # HWIO
        "cb1": 0.1 * jax.random.normal(ks[3], (1, cout), jnp.float32),
        "g2": jax.random.uniform(ks[4], (1, cout), jnp.float32, 0.5, 1.5),
        "b2": 0.1 * jax.random.normal(ks[5], (1, cout), jnp.float32),
        "w2": 0.2 * jax.random.normal(ks[6], (3, 3, cout, cout), jnp.float32),
        "cb2": 0.1 * jax.random.normal(ks[7], (1, cout), jnp.float32),
    }
    if downsample:
        p["wd"] = 0.2 * jax.random.normal(ks[8], (cin, cout), jnp.float32)
        p["bd"] = 0.1 * jax.random.normal(ks[9], (1, cout), jnp.float32)
    return p


def reference_forward(x_nchw, p, *, stride=1, downsample=False,
                      matmul_dtype=jnp.float32):
    """Pure-JAX reference mirroring the PyTorch forward (training-mode BN).
    matmul_dtype lets the reference mirror the kernel's mixed-precision MXU policy."""
    x = jnp.transpose(x_nchw, (0, 2, 3, 1)).astype(jnp.float32)

    def bn_relu(t, g, b):
        mean = jnp.mean(t, axis=(0, 1, 2), keepdims=True)
        var = jnp.mean((t - mean) ** 2, axis=(0, 1, 2), keepdims=True)
        return jnp.maximum((t - mean) * lax.rsqrt(var + EPS) * g.reshape(1, 1, 1, -1)
                           + b.reshape(1, 1, 1, -1), 0.0)

    def conv(t, w, s, pad):
        return lax.conv_general_dilated(
            t.astype(matmul_dtype), w.astype(matmul_dtype), (s, s), pad,
            dimension_numbers=("NHWC", "HWIO", "NHWC"),
            preferred_element_type=jnp.float32)

    a1 = bn_relu(x, p["g1"], p["b1"])
    h1 = conv(a1, p["w1"], stride, ((1, 1), (1, 1))) + p["cb1"].reshape(1, 1, 1, -1)
    a2 = bn_relu(h1, p["g2"], p["b2"])
    h2 = conv(a2, p["w2"], 1, ((1, 1), (1, 1))) + p["cb2"].reshape(1, 1, 1, -1)
    if downsample:
        wd = p["wd"].reshape(1, 1, *p["wd"].shape)
        res = conv(a1, wd, stride, ((0, 0), (0, 0))) + p["bd"].reshape(1, 1, 1, -1)
    else:
        res = x
    return jnp.transpose(h2 + res, (0, 3, 1, 2))


if __name__ == "__main__":
    key = jax.random.PRNGKey(0)
    kx, kpa, kpb = jax.random.split(key, 3)

    # NCHW input: batch=2, channels=4, spatial=16x16
    x = jax.random.normal(kx, (2, 4, 16, 16), jnp.float32)

    # Config A: identity residual (Cin==Cout, stride=1), f32 MXU path, tight check.
    pA = init_params(kpa, 4, 4, downsample=False)
    outA = jax.block_until_ready(
        wide_block_forward(x, pA, stride=1, downsample=False,
                           matmul_dtype=jnp.float32))
    refA = reference_forward(x, pA, stride=1, downsample=False)
    np.testing.assert_allclose(np.asarray(outA), np.asarray(refA), rtol=2e-3, atol=2e-3)

    # Config B: channel expansion 4 -> 8 with 1x1 downsample residual, f32 MXU path.
    pB = init_params(kpb, 4, 8, downsample=True)
    outB = jax.block_until_ready(
        wide_block_forward(x, pB, stride=1, downsample=True,
                           matmul_dtype=jnp.float32))
    refB = reference_forward(x, pB, stride=1, downsample=True)
    np.testing.assert_allclose(np.asarray(outB), np.asarray(refB), rtol=2e-3, atol=2e-3)

    # Config C: bf16 MXU path (default perf config) vs a matching mixed-precision ref.
    outC = jax.block_until_ready(
        wide_block_forward(x, pB, stride=1, downsample=True,
                           matmul_dtype=jnp.bfloat16))
    refC = reference_forward(x, pB, stride=1, downsample=True,
                             matmul_dtype=jnp.bfloat16)
    np.testing.assert_allclose(np.asarray(outC), np.asarray(refC), rtol=5e-3, atol=5e-3)

    print("KERNEL_OK")
</pallas_src>

<mosaic_0001>
module attributes {stable_mosaic.version = 11 : i64} {
  func.func @kernel(%arg0: i32, %arg1: memref<1x16x16x128xf32, #tpu.memory_space<vmem>>, %arg2: memref<1x2x128xf32, #tpu.memory_space<vmem>>) attributes {dimension_semantics = [#tpu.dimension_semantics<parallel>], iteration_bounds = array<i64: 2>, scalar_prefetch = 0 : i64, scratch_operands = 0 : i64, tpu.core_type = #tpu.core_type<tc>, window_params = [{transform_indices = @transform_0, window_bounds = array<i64: 1, 16, 16, 128>}, {transform_indices = @transform_1, window_bounds = array<i64: 1, 2, 128>}]} {
    %c0 = arith.constant 0 : index
    %c0_0 = arith.constant 0 : index
    %c0_1 = arith.constant 0 : index
    %c0_2 = arith.constant 0 : index
    %0 = vector.load %arg1[%c0, %c0_0, %c0_1, %c0_2] : memref<1x16x16x128xf32, #tpu.memory_space<vmem>>, vector<1x16x16x128xf32>
    %1 = vector.shape_cast %0 : vector<1x16x16x128xf32> to vector<256x128xf32>
    %cst = arith.constant dense<0.000000e+00> : vector<128xf32>
    %2 = vector.multi_reduction <add>, %1, %cst [0] : vector<256x128xf32> to vector<128xf32>
    %3 = vector.shape_cast %2 : vector<128xf32> to vector<1x128xf32>
    %4 = arith.mulf %1, %1 : vector<256x128xf32>
    %cst_3 = arith.constant dense<0.000000e+00> : vector<128xf32>
    %5 = vector.multi_reduction <add>, %4, %cst_3 [0] : vector<256x128xf32> to vector<128xf32>
    %6 = vector.shape_cast %5 : vector<128xf32> to vector<1x128xf32>
    %7 = tpu.concatenate %3, %6 in 0 : vector<1x128xf32>, vector<1x128xf32> -> vector<2x128xf32>
    %8 = vector.shape_cast %7 : vector<2x128xf32> to vector<1x2x128xf32>
    %c0_4 = arith.constant 0 : index
    %c0_5 = arith.constant 0 : index
    %c0_6 = arith.constant 0 : index
    %9 = vector.load %arg2[%c0_4, %c0_5, %c0_6] : memref<1x2x128xf32, #tpu.memory_space<vmem>>, vector<1x2x128xf32>
    tpu.vector_store %arg2[%c0_4, %c0_5, %c0_6], %8 {strides = array<i32>} : memref<1x2x128xf32, #tpu.memory_space<vmem>>, vector<1x2x128xf32>,
    return
  }
  func.func @transform_0(%arg0: i32) -> (i32, i32, i32, i32) {
    %c0_i32 = arith.constant 0 : i32
    %c0_i32_0 = arith.constant 0 : i32
    %c0_i32_1 = arith.constant 0 : i32
    %c0_i32_2 = arith.constant 0 : i32
    return %arg0, %c0_i32, %c0_i32_0, %c0_i32_1 : i32, i32, i32, i32
  }
  func.func @transform_1(%arg0: i32) -> (i32, i32, i32) {
    %c0_i32 = arith.constant 0 : i32
    %c0_i32_0 = arith.constant 0 : i32
    %c0_i32_1 = arith.constant 0 : i32
    return %arg0, %c0_i32, %c0_i32_0 : i32, i32, i32
  }
}

</mosaic_0001>

<bundles_post_ra>
// kernel: tpu_custom_call.1
= control target key start
LH: loop header
LB: loop body
LE: loop exit
PB: predicated region body
PF: predicated region fallthrough
CT: control target
= control target key end

     0   :  { %6 = vsyncpa [#allocation3], 0  ;;  %s729_s0 = inlined_call_operand.hbm [shape: f32[2,16,16,128], index: 0, kind: input, shape index: {}]   ;;  %s730_s1 = inlined_call_operand.hbm [shape: f32[2,2,128], index: 1, kind: output, shape index: {}]  }
   0x1   :  { %8 = vsyncpa [#allocation3 + $0x1], 0 }
   0x2   :  { %9 = vsyncpa [#allocation4], 0 }
   0x3   :  { %11 = vsyncpa [#allocation4 + $0x1], 0  ;;  %s534_s6 = smov 0   ;;  %s536_s7 = smov 0  }
   0x4   :  { %s538_s8 = smov 0   ;;  %s540_s9 = smov 0  }
   0x5 LB: > { %s555_s10 = sadd.s32 4294967295, %s518_s9   ;;  %s360_s11 = sadd.s32 4294967294, %s518_s9   ;;  %s518_s9 = sphi %s540_s9, %s743_s9   ;;  %s514_s8 = sphi %s538_s8, %s742_s8   ;;  %s510_s7 = sphi %s536_s7, %s741_s7   ;;  %s506_s6 = sphi %s534_s6, %s740_s6  }
   0x6   : > { %s559_s12 = sadd.s32 1, %s518_s9   ;;  %s24_s13 = sadd.s32 1, %s514_s8 }
   0x7   : > { %s21_s14 = ssub.s32 %s518_s9, %s559_s12  ;;  %p31_p0 = scmp.ne.s32.totalorder %s514_s8, %s510_s7 }
   0x8   : > { %p22_p1 = scmp.eq.s32.totalorder %s21_s14, 0  ;;  %p32_p2 = scmp.eq.s32.totalorder %s518_s9, 0 }
   0x9   : > { %p37_p3 = scmp.ne.s32.totalorder %s510_s7, %s506_s6  ;;  %p38_p4 = scmp.eq.s32.totalorder %s555_s10, 0 }
   0xa   : > { %s571_s15 = scalar_select %p22_p1, %s514_s8, %s24_s13  }
   0xb   : > { %p573_p5 = por %p32_p2, %p31_p0  ;;  %p577_p6 = por %p38_p4, %p37_p3 }
   0xc   : > { %p61_p7 = scmp.eq.s32.totalorder %s555_s10, 1  ;;  %p67_p8 = scmp.eq.s32.totalorder %s360_s11, 1 }
   0xd   : > { %p386_p10 = scmp.lt.s32.totalorder %s518_s9, 2  ;;  %s87_s20 = sand.u32 1, %s514_s8  }
   0xe   : > { %p584_p11 = por %p61_p7, %p31_p0  ;;  %p588_p12 = por %p67_p8, %p37_p3 }
   0xf   : > { %s373_s21 = sshll.u32 %s518_s9, 12  ;;  %s363_s22 = sshll.u32 %s87_s20, 8 }
  0x10   : > { %s734_s18 = scalar_select %p584_p11, 1, 0 }
  0x11   : > { %s735_s19 = scalar_select %p588_p12, 1, 0 }
  0x12   : > { %s597_s25 = scalar_lea.hbm %s729_s0, %s373_s21  ;;  %s91_s26 = scalar_lea.vmem [#allocation2], %s363_s22 }
  0x13   : > { %s98_s27 = sshll.u32 %s91_s26, 4  ;;  %p601_p13 = pnand %p386_p10, %p573_p5  ;;  %s605_s27 = int_to_ptr.vmem [resolvable:$true] %s98_s27 }
  0x14   : > { %s607_s29 = scalar_lea.sflag [#allocation3], %s87_s20  ;;  %s422_s30 = scalar_lea.hbm %s597_s25, 4096 }
  0x15   : > { %p423_p0 = scmp.ne.s32.totalorder %s597_s25, %s422_s30  ;;  %p424_p1 = pneg %p601_p13 }
  0x16   : > { %s427_s4 = scalar_lea.hbm %s729_s0, 8192  ;;  %p428_p4 = scmp.lt.u32.totalorder %s597_s25, %s729_s0 }
  0x17   : > { %p425_p2 = pnand %p424_p1, %p423_p0  ;;  %p429_p5 = scmp.lt.u32.totalorder %s427_s4, %s422_s30 }
  0x18   : > { %p431_p8 = scmp.lt.u32.totalorder %s422_s30, %s597_s25 }
  0x19   : > { %p426_p3 = pneg %p425_p2  ;;  %p430_p7 = por %p429_p5, %p428_p4 }
  0x1b   : > { %p432_p10 = por %p431_p8, %p430_p7 }
  0x1d   : > { %p433_p9 = pnand %p432_p10, %p426_p3 }
  0x1f   : > { %436 = shalt.err (!%p433_p9)
}
  0x20   : > { %s437_s13 = scalar_lea.vmem %s605_s27, 4096  ;;  %s520_s14 = smov [#allocation2]  }
  0x21   : > { %p438_p0 = scmp.ne.s32.totalorder %s605_s27, %s437_s13  ;;  %s442_s16 = sshll.u32 %s520_s14, 4  ;;  %s443_s16 = int_to_ptr.vmem [resolvable:$false] %s442_s16 }
  0x22   : > { %s444_s20 = scalar_lea.vmem %s443_s16, 8192  ;;  %p445_p11 = scmp.lt.s32.totalorder %s605_s27, %s443_s16 }
  0x23   : > { %p440_p2 = pnand %p438_p0, %p424_p1  ;;  %p446_p4 = scmp.lt.s32.totalorder %s444_s20, %s437_s13 }
  0x25   : > { %p441_p12 = pneg %p440_p2  ;;  %p447_p5 = por %p446_p4, %p445_p11 }
  0x27   : > { %p448_p7 = pnand %p447_p5, %p441_p12 }
  0x29   : > { %451 = shalt.err (!%p448_p7)
}
  0x2a   : > { %s521_s21 = smov 128   ;;  %s522_s22 = smov 8  }
  0x2b   : > { %381 = dma.hbm_to_vmem [thread:$0]  (!%p601_p13), %s597_s25, 4096, %s605_s27, %s607_s29, %s521_s21, %s521_s21, %s522_s22  }
  0x2c   : > { %p366_p9 = scmp.ge.s32.totalorder %s518_s9, 1  ;;  %p106_p1 = scmp.lt.s32.totalorder %s518_s9, 3 }
  0x2e   : > { %p107_p3 = pnand %p366_p9, %p106_p1 }
  0x2f   : > { %s638_s23 = sand.u32 (!%p107_p3), 1, %s510_s7  }
  0x30   : > { %110 = sbr.rel (%p107_p3) target bundleno = 148 (0x94), region = 24  ;;  %s367_s24 = sshll.u32 (!%p107_p3), %s638_s23, 8 }
  0x31   : > { %s113_s26 = scalar_lea.sflag (!%p107_p3), [#allocation3], %s638_s23  ;;  %s642_s30 = scalar_lea.vmem (!%p107_p3), [#allocation2], %s367_s24 }
  0x37   : > { %497 = dma.done.wait (%p577_p6), %s113_s26, 4096  }
  0x38   : > { %499 = vsyncadd (%p577_p6), %s113_s26, 4294963200  ;;  %v135_v0 = vld [vmem:[%s642_s30] sm:$0xff]  ;;  %v136_v1 = vld [vmem:[%s642_s30 + $0x8] sm:$0xff]  ;;  %s368_s17 = sshll.u32 %s638_s23, 1  ;;  %s370_s28 = sshll.u32 %s555_s10, 5  ;;  %vm273_vm0 = vcmask 1040384  }
  0x39   : > { %v137_v2 = vld [vmem:[%s642_s30 + $0x10] sm:$0xff]  ;;  %v138_v3 = vld [vmem:[%s642_s30 + $0x18] sm:$0xff]  ;;  %v167_v4 = vadd.f32 %v136_v1, %v135_v0  ;;  %v204_v5 = vmul.f32 %v135_v0, %v135_v0  ;;  %v205_v6 = vmul.f32 %v136_v1, %v136_v1  ;;  %v139_v8 = vld [vmem:[%s642_s30 + $0x20] sm:$0xff]  ;;  %s134_s25 = scalar_lea.vmem [#allocation5], %s368_s17  ;;  %s687_s3 = scalar_lea.hbm %s730_s1, %s370_s28 }
  0x3a   : > { %v206_v7 = vmul.f32 %v137_v2, %v137_v2  ;;  %v207_v10 = vmul.f32 %v138_v3, %v138_v3  ;;  %v140_v12 = vld [vmem:[%s642_s30 + $0x28] sm:$0xff]  ;;  %v208_v14 = vmul.f32 %v139_v8, %v139_v8  ;;  %v141_v16 = vld [vmem:[%s642_s30 + $0x30] sm:$0xff]  ;;  %v142_v20 = vld [vmem:[%s642_s30 + $0x38] sm:$0xff]  ;;  %s290_s27 = sshll.u32 %s134_s25, 4  ;;  %s277_s4 = scalar_lea.sflag [#allocation4], %s638_s23  ;;  %s682_s27 = int_to_ptr.vmem [resolvable:$true] %s290_s27 }
  0x3b   : > { %v168_v9 = vadd.f32 %v167_v4, %v137_v2  ;;  %v236_v11 = vadd.f32 %v205_v6, %v204_v5  ;;  %v209_v18 = vmul.f32 %v140_v12, %v140_v12  ;;  %v210_v22 = vmul.f32 %v141_v16, %v141_v16  ;;  %v143_v24 = vld [vmem:[%s642_s30 + $0x40] sm:$0xff]  ;;  %v144_v28 = vld [vmem:[%s642_s30 + $0x48] sm:$0xff]  ;;  %v145_v32 = vld [vmem:[%s642_s30 + $0x50] sm:$0xff]  ;;  %s452_s5 = scalar_lea.vmem %s682_s27, 32  ;;  %p737_p11 = scmp.ne.s32.totalorder %s734_s18, 0 }
  0x3c   : > { %v211_v26 = vmul.f32 %v142_v20, %v142_v20  ;;  %v212_v30 = vmul.f32 %v143_v24, %v143_v24  ;;  %v213_v34 = vmul.f32 %v144_v28, %v144_v28  ;;  %v146_v36 = vld [vmem:[%s642_s30 + $0x58] sm:$0xff]  ;;  %v214_v38 = vmul.f32 %v145_v32, %v145_v32  ;;  %v147_v40 = vld [vmem:[%s642_s30 + $0x60] sm:$0xff]  ;;  %v148_v44 = vld [vmem:[%s642_s30 + $0x68] sm:$0xff]  ;;  %p453_p6 = scmp.ne.s32.totalorder %s682_s27, %s452_s5  ;;  %s523_s10 = smov [#allocation5]  }
  0x3d   : > { %v169_v13 = vadd.f32 %v168_v9, %v138_v3  ;;  %v237_v15 = vadd.f32 %v236_v11, %v206_v7  ;;  %v215_v42 = vmul.f32 %v146_v36, %v146_v36  ;;  %v216_v46 = vmul.f32 %v147_v40, %v147_v40  ;;  %v149_v48 = vld [vmem:[%s642_s30 + $0x70] sm:$0xff]  ;;  %v150_v52 = vld [vmem:[%s642_s30 + $0x78] sm:$0xff]  ;;  %v151_v56 = vld [vmem:[%s642_s30 + $0x80] sm:$0xff]  ;;  %s456_s11 = sshll.u32 %s523_s10, 4  ;;  %s457_s11 = int_to_ptr.vmem [resolvable:$false] %s456_s11 }
  0x3e   : > { %v217_v50 = vmul.f32 %v148_v44, %v148_v44  ;;  %v218_v54 = vmul.f32 %v149_v48, %v149_v48  ;;  %v219_v58 = vmul.f32 %v150_v52, %v150_v52  ;;  %v152_v60 = vld [vmem:[%s642_s30 + $0x88] sm:$0xff]  ;;  %v220_v62 = vmul.f32 %v151_v56, %v151_v56  ;;  %v153_v0 = vld [vmem:[%s642_s30 + $0x90] sm:$0xff]  ;;  %v154_v4 = vld [vmem:[%s642_s30 + $0x98] sm:$0xff]  ;;  %p454_p12 = pnand %p453_p6, %p737_p11  ;;  %s458_s13 = scalar_lea.vmem %s457_s11, 64 }
  0x3f   : > { %v170_v17 = vadd.f32 %v169_v13, %v139_v8  ;;  %v238_v19 = vadd.f32 %v237_v15, %v207_v10  ;;  %v221_v2 = vmul.f32 %v152_v60, %v152_v60  ;;  %v222_v6 = vmul.f32 %v153_v0, %v153_v0  ;;  %v155_v8 = vld [vmem:[%s642_s30 + $0xa0] sm:$0xff]  ;;  %p459_p8 = scmp.lt.s32.totalorder %s682_s27, %s457_s11  ;;  %p460_p10 = scmp.lt.s32.totalorder %s458_s13, %s452_s5 }
  0x40   : > { %v223_v10 = vmul.f32 %v154_v4, %v154_v4  ;;  %p455_p13 = pneg %p454_p12 }
  0x41   : > { %v171_v21 = vadd.f32 %v170_v17, %v140_v12  ;;  %v239_v23 = vadd.f32 %v238_v19, %v208_v14  ;;  %v156_v12 = vld [vmem:[%s642_s30 + $0xa8] sm:$0xff]  ;;  %v224_v14 = vmul.f32 %v155_v8, %v155_v8  ;;  %p461_p0 = por %p460_p10, %p459_p8 }
  0x43   : > { %v172_v25 = vadd.f32 %v171_v21, %v141_v16  ;;  %v240_v27 = vadd.f32 %v239_v23, %v209_v18  ;;  %v157_v16 = vld [vmem:[%s642_s30 + $0xb0] sm:$0xff]  ;;  %v225_v18 = vmul.f32 %v156_v12, %v156_v12  ;;  %p462_p2 = pnand %p461_p0, %p455_p13 }
  0x45   : > { %v173_v29 = vadd.f32 %v172_v25, %v142_v20  ;;  %v241_v31 = vadd.f32 %v240_v27, %v210_v22  ;;  %v158_v20 = vld [vmem:[%s642_s30 + $0xb8] sm:$0xff]  ;;  %v226_v22 = vmul.f32 %v157_v16, %v157_v16 }
  0x47   : > { %v174_v33 = vadd.f32 %v173_v29, %v143_v24  ;;  %v242_v35 = vadd.f32 %v241_v31, %v211_v26  ;;  %v159_v24 = vld [vmem:[%s642_s30 + $0xc0] sm:$0xff]  ;;  %v227_v26 = vmul.f32 %v158_v20, %v158_v20 }
  0x49   : > { %v175_v37 = vadd.f32 %v174_v33, %v144_v28  ;;  %v243_v39 = vadd.f32 %v242_v35, %v212_v30  ;;  %v160_v28 = vld [vmem:[%s642_s30 + $0xc8] sm:$0xff]  ;;  %v228_v30 = vmul.f32 %v159_v24, %v159_v24 }
  0x4b   : > { %v176_v41 = vadd.f32 %v175_v37, %v145_v32  ;;  %v244_v43 = vadd.f32 %v243_v39, %v213_v34  ;;  %v161_v32 = vld [vmem:[%s642_s30 + $0xd0] sm:$0xff]  ;;  %v229_v34 = vmul.f32 %v160_v28, %v160_v28 }
  0x4d   : > { %v177_v45 = vadd.f32 %v176_v41, %v146_v36  ;;  %v245_v47 = vadd.f32 %v244_v43, %v214_v38  ;;  %v162_v36 = vld [vmem:[%s642_s30 + $0xd8] sm:$0xff]  ;;  %v230_v38 = vmul.f32 %v161_v32, %v161_v32 }
  0x4f   : > { %v178_v49 = vadd.f32 %v177_v45, %v147_v40  ;;  %v246_v51 = vadd.f32 %v245_v47, %v215_v42  ;;  %v163_v40 = vld [vmem:[%s642_s30 + $0xe0] sm:$0xff]  ;;  %v231_v42 = vmul.f32 %v162_v36, %v162_v36 }
  0x51   : > { %v179_v53 = vadd.f32 %v178_v49, %v148_v44  ;;  %v247_v55 = vadd.f32 %v246_v51, %v216_v46  ;;  %v164_v44 = vld [vmem:[%s642_s30 + $0xe8] sm:$0xff]  ;;  %v232_v46 = vmul.f32 %v163_v40, %v163_v40 }
  0x53   : > { %v180_v57 = vadd.f32 %v179_v53, %v149_v48  ;;  %v248_v59 = vadd.f32 %v247_v55, %v217_v50  ;;  %v165_v48 = vld [vmem:[%s642_s30 + $0xf0] sm:$0xff]  ;;  %v233_v50 = vmul.f32 %v164_v44, %v164_v44 }
  0x55   : > { %v181_v61 = vadd.f32 %v180_v57, %v150_v52  ;;  %v249_v63 = vadd.f32 %v248_v59, %v218_v54  ;;  %v166_v52 = vld [vmem:[%s642_s30 + $0xf8] sm:$0xff]  ;;  %v234_v54 = vmul.f32 %v165_v48, %v165_v48 }
  0x56   : > { %v235_v57 = vmul.f32 %v166_v52, %v166_v52 }
  0x57   : > { %v182_v1 = vadd.f32 %v181_v61, %v151_v56  ;;  %v250_v3 = vadd.f32 %v249_v63, %v219_v58 }
  0x59   : > { %v183_v5 = vadd.f32 %v182_v1, %v152_v60  ;;  %v251_v7 = vadd.f32 %v250_v3, %v220_v62 }
  0x5b   : > { %v184_v9 = vadd.f32 %v183_v5, %v153_v0  ;;  %v252_v11 = vadd.f32 %v251_v7, %v221_v2 }
  0x5d   : > { %v185_v13 = vadd.f32 %v184_v9, %v154_v4  ;;  %v253_v15 = vadd.f32 %v252_v11, %v222_v6 }
  0x5f   : > { %v186_v17 = vadd.f32 %v185_v13, %v155_v8  ;;  %v254_v19 = vadd.f32 %v253_v15, %v223_v10 }
  0x61   : > { %v187_v21 = vadd.f32 %v186_v17, %v156_v12  ;;  %v255_v23 = vadd.f32 %v254_v19, %v224_v14 }
  0x63   : > { %v188_v25 = vadd.f32 %v187_v21, %v157_v16  ;;  %v256_v27 = vadd.f32 %v255_v23, %v225_v18 }
  0x65   : > { %v189_v29 = vadd.f32 %v188_v25, %v158_v20  ;;  %v257_v31 = vadd.f32 %v256_v27, %v226_v22 }
  0x67   : > { %v190_v33 = vadd.f32 %v189_v29, %v159_v24  ;;  %v258_v35 = vadd.f32 %v257_v31, %v227_v26 }
  0x69   : > { %v191_v37 = vadd.f32 %v190_v33, %v160_v28  ;;  %v259_v39 = vadd.f32 %v258_v35, %v228_v30 }
  0x6b   : > { %v192_v41 = vadd.f32 %v191_v37, %v161_v32  ;;  %v260_v43 = vadd.f32 %v259_v39, %v229_v34 }
  0x6d   : > { %v193_v45 = vadd.f32 %v192_v41, %v162_v36  ;;  %v261_v47 = vadd.f32 %v260_v43, %v230_v38 }
  0x6f   : > { %v194_v49 = vadd.f32 %v193_v45, %v163_v40  ;;  %v262_v51 = vadd.f32 %v261_v47, %v231_v42 }
  0x71   : > { %v195_v53 = vadd.f32 %v194_v49, %v164_v44  ;;  %v263_v55 = vadd.f32 %v262_v51, %v232_v46 }
  0x73   : > { %v196_v56 = vadd.f32 %v195_v53, %v165_v48  ;;  %v264_v58 = vadd.f32 %v263_v55, %v233_v50 }
  0x75   : > { %v197_v59 = vadd.f32 %v196_v56, %v166_v52  ;;  %v265_v60 = vadd.f32 %v264_v58, %v234_v54 }
  0x77   : > { %v198_v61 = vrot.slane %v197_v59, 4  ;;  %v266_v62 = vadd.f32 %v265_v60, %v235_v57 }
  0x79   : > { %v199_v63 = vadd.f32 %v198_v61, %v197_v59  ;;  %v267_v0 = vrot.slane %v266_v62, 4 }
  0x7b   : > { %v200_v1 = vrot.slane %v199_v63, 2  ;;  %v268_v2 = vadd.f32 %v267_v0, %v266_v62 }
  0x7d   : > { %v201_v3 = vadd.f32 %v200_v1, %v199_v63  ;;  %v269_v4 = vrot.slane %v268_v2, 2 }
  0x7f   : > { %v202_v5 = vrot.slane %v201_v3, 1  ;;  %v270_v6 = vadd.f32 %v269_v4, %v268_v2 }
  0x81   : > { %v203_v7 = vadd.f32 %v202_v5, %v201_v3  ;;  %v271_v8 = vrot.slane %v270_v6, 1 }
  0x83   : > { %v272_v9 = vadd.f32 %v271_v8, %v270_v6 }
  0x85   : > { %v274_v10 = vsel %vm273_vm0, %v203_v7, %v272_v9 }
  0x86   : > { %275 = vst [vmem:[%s134_s25] sm:$0x3] %v274_v10 }
  0x87   : > { %465 = shalt.err (!%p462_p2)
}
  0x88   : > { %s466_s14 = scalar_lea.hbm %s687_s3, 32  ;;  %s470_s21 = scalar_lea.hbm %s730_s1, 64 }
  0x89   : > { %p467_p4 = scmp.ne.s32.totalorder %s687_s3, %s466_s14  ;;  %p471_p9 = scmp.lt.u32.totalorder %s687_s3, %s730_s1 }
  0x8a   : > { %p472_p1 = scmp.lt.u32.totalorder %s470_s21, %s466_s14  ;;  %p474_p6 = scmp.lt.u32.totalorder %s466_s14, %s687_s3 }
  0x8b   : > { %p468_p5 = pnand %p467_p4, %p737_p11 }
  0x8c   : > { %p473_p3 = por %p472_p1, %p471_p9 }
  0x8d   : > { %p469_p7 = pneg %p468_p5 }
  0x8e   : > { %p475_p12 = por %p474_p6, %p473_p3 }
  0x90   : > { %p476_p13 = pnand %p475_p12, %p469_p7 }
  0x92   : > { %479 = shalt.err (!%p476_p13)
}
  0x93   : > { %376 = dma.vmem_to_hbm [thread:$0]  (%p737_p11), %s682_s27, 32, %s687_s3, %s277_s4  }
  0x94 PF: > { %s302_s24 = sand.u32 1, %s506_s6   ;;  %p738_p8 = scmp.ne.s32.totalorder %s735_s19, 0 }
  0x95   : > { %p739_p10 = scmp.ge.s32.totalorder %s518_s9, 2  ;;  %s303_s26 = scalar_lea.sflag [#allocation4], %s302_s24 }
  0x97   : > { %p383_p0 = pnand %p739_p10, %p738_p8 }
  0x99   : > { %501 = dma.done.wait (!%p383_p0), %s303_s26, 32  }
  0x9a   : > { %503 = vsyncadd (!%p383_p0), %s303_s26, 4294967264  ;;  %p14_p2 = scmp.ge.s32.totalorder %s559_s12, 4   ;;  %s740_s6 = smov %s510_s7 }
  0x9b   : > { %s741_s7 = smov %s514_s8  ;;  %s742_s8 = smov %s571_s15 }
  0x9c   : > { %s743_s9 = smov %s559_s12  ;;  %16 = sbr.rel (!%p14_p2) target bundleno = 5 (0x5), region = 69 }
  0xa3   :  { %308 = vsyncpa [#allocation3], 1 }
  0xa4   :  { %310 = vsyncpa [#allocation3 + $0x1], 1 }
  0xa5   :  { %311 = vsyncpa [#allocation4], 1 }
  0xa6   :  { %313 = vsyncpa [#allocation4 + $0x1], 1 }

</bundles_post_ra>
